<compile_context>
chip_gen: v7x
topology: tpu7x:2x2x1
jax: 0.10.0
libtpu: 0.0.40
codegen_flags: <defaults>
</compile_context>

<pallas_src>
import functools

import jax
import jax.numpy as jnp
from jax import lax
from jax.experimental import pallas as pl
from jax.experimental.pallas import tpu as pltpu


def _dilated_residual_kernel(x_ref, scale_ref, bias_ref, w_ref, cb_ref,
                             mask_ref, o_ref, *, H, W, C, dilation):
    """One image per grid step, flattened-spatial (lane-dense) layout.

    x_ref    : (C, H*W)    input image (pre-BN); also the residual
    scale_ref: (C, 1)      folded BN scale = gamma / sqrt(var + eps)
    bias_ref : (C, 1)      folded BN bias  = beta - mean * scale
    w_ref    : (9, C, C)   conv weights, w_ref[kh*3+kw] = W[:, :, kh, kw]  (Cout, Cin)
    cb_ref   : (C, 1)      conv bias
    mask_ref : (9, 1, H*W) 'same'-padding validity masks per tap (1.0 / 0.0)
    o_ref    : (C, H*W)    output
    """
    L = H * W
    d = dilation

    x = x_ref[...]                                            # (C, L) f32
    # Fused BatchNorm (pre-folded scale/bias) + ReLU.
    y = jnp.maximum(x * scale_ref[...] + bias_ref[...], 0.0)  # (C, L)

    # Seed the accumulator with residual + conv bias (each broadcast used once).
    acc = x + cb_ref[...]                                     # (C, L)

    # 3x3 dilated conv: 9 taps = lane roll + boundary mask + (Cout,Cin)@(Cin,L).
    for kh in range(3):
        for kw in range(3):
            off = (kh - 1) * d * W + (kw - 1) * d
            t = kh * 3 + kw
            if off == 0:
                tap = y                                       # center tap: no shift, no mask
            else:
                # tap[c, q] = y[c, q + off] when inside the image, else 0.
                tap = pltpu.roll(y, shift=(-off) % L, axis=1) * mask_ref[t]
            acc = acc + jnp.dot(w_ref[t], tap,
                                preferred_element_type=jnp.float32)

    o_ref[...] = acc.astype(o_ref.dtype)


def dilated_residual_pallas(x_nchw, gamma, beta, conv_w_oihw, conv_b,
                            conv_dilation, eps=1e-5):
    """x_nchw: (N, C, H, W) float32.  Returns (N, C, H, W)."""
    N, C, H, W = x_nchw.shape
    d = int(conv_dilation)
    L = H * W

    # Flatten spatial; NO transpose (lane dim = H*W).
    x = x_nchw.reshape(N, C, L).astype(jnp.float32)

    # BatchNorm2d training-mode stats (per-channel, biased variance) in one
    # fused pass (sum & sum of squares), folded into per-channel scale/bias.
    cnt = float(N * L)
    s1 = jnp.sum(x, axis=(0, 2))
    s2 = jnp.sum(x * x, axis=(0, 2))
    mean = s1 / cnt
    var = s2 / cnt - mean * mean
    inv = gamma.astype(jnp.float32) / jnp.sqrt(var + eps)
    scale = inv.reshape(C, 1)
    bias = (beta.astype(jnp.float32) - mean * inv).reshape(C, 1)

    # (Cout, Cin, kh, kw) -> (kh*3+kw, Cout, Cin)
    w9 = jnp.transpose(conv_w_oihw.astype(jnp.float32),
                       (2, 3, 0, 1)).reshape(9, C, C)
    cb = conv_b.reshape(C, 1).astype(jnp.float32)

    # Precompute the 9 'same'-padding validity masks over the flat spatial
    # index (tiny, computed once; keeps int div / iota out of the kernel).
    rows = jnp.arange(L, dtype=jnp.int32) // W
    cols = jnp.arange(L, dtype=jnp.int32) % W
    masks = []
    for kh in range(3):
        dh = (kh - 1) * d
        for kw in range(3):
            dw = (kw - 1) * d
            valid = ((rows + dh >= 0) & (rows + dh < H) &
                     (cols + dw >= 0) & (cols + dw < W))
            masks.append(valid)
    mask9 = jnp.stack(masks).astype(jnp.float32).reshape(9, 1, L)

    kernel = functools.partial(_dilated_residual_kernel,
                               H=H, W=W, C=C, dilation=d)

    cost = pl.CostEstimate(
        flops=2 * 9 * C * C * N * L + 6 * N * C * L,
        transcendentals=0,
        bytes_accessed=4 * (2 * N * C * L + 9 * C * C + 9 * L + 3 * C))

    out = pl.pallas_call(
        kernel,
        out_shape=jax.ShapeDtypeStruct((N, C, L), jnp.float32),
        grid=(N,),
        in_specs=[
            pl.BlockSpec((None, C, L), lambda n: (n, 0, 0)),   # x (per image)
            pl.BlockSpec((C, 1), lambda n: (0, 0)),            # BN scale
            pl.BlockSpec((C, 1), lambda n: (0, 0)),            # BN bias
            pl.BlockSpec((9, C, C), lambda n: (0, 0, 0)),      # conv weights
            pl.BlockSpec((C, 1), lambda n: (0, 0)),            # conv bias
            pl.BlockSpec((9, 1, L), lambda n: (0, 0, 0)),      # tap masks
        ],
        out_specs=pl.BlockSpec((None, C, L), lambda n: (n, 0, 0)),
        compiler_params=pltpu.CompilerParams(
            dimension_semantics=("parallel",)),
        cost_estimate=cost,
    )(x, scale, bias, w9, cb, mask9)

    return out.reshape(N, C, H, W)


def dilated_residual_reference(x_nchw, gamma, beta, conv_w_oihw, conv_b,
                               conv_dilation, eps=1e-5):
    """Pure-JAX reference matching the PyTorch forward (training-mode BN)."""
    mean = jnp.mean(x_nchw, axis=(0, 2, 3), keepdims=True)
    var = jnp.mean((x_nchw - mean) ** 2, axis=(0, 2, 3), keepdims=True)
    out = (x_nchw - mean) / jnp.sqrt(var + eps)
    out = out * gamma.reshape(1, -1, 1, 1) + beta.reshape(1, -1, 1, 1)
    out = jnp.maximum(out, 0.0)
    d = int(conv_dilation)
    out = lax.conv_general_dilated(
        out, conv_w_oihw, window_strides=(1, 1),
        padding=((d, d), (d, d)), rhs_dilation=(d, d),
        dimension_numbers=("NCHW", "OIHW", "NCHW"))
    out = out + conv_b.reshape(1, -1, 1, 1)
    return out + x_nchw


if __name__ == "__main__":
    # Small shapes consistent with the module: NCHW input.
    N, C, H, W = 2, 4, 16, 16
    module_dilation = 1       # __init__ arg `dilation`
    # The `dropout` __init__ arg is unused in forward().

    key = jax.random.PRNGKey(0)
    keys = jax.random.split(key, 12)

    x = jax.random.normal(keys[0], (N, C, H, W), dtype=jnp.float32)

    # Deterministic synthetic parameters (not a checkpoint).
    gamma = 1.0 + 0.1 * jax.random.normal(keys[1], (C,), dtype=jnp.float32)
    beta = 0.1 * jax.random.normal(keys[2], (C,), dtype=jnp.float32)

    # conv1 is dead compute in the reference forward (its output is
    # overwritten), so its weights are created but never used.
    conv1_w = 0.1 * jax.random.normal(keys[3], (C, C, 3, 3), dtype=jnp.float32)
    conv1_b = 0.1 * jax.random.normal(keys[4], (C,), dtype=jnp.float32)

    rconv1_w = 0.1 * jax.random.normal(keys[5], (C, C, 3, 3), dtype=jnp.float32)
    rconv1_b = 0.1 * jax.random.normal(keys[6], (C,), dtype=jnp.float32)
    rconv2_w = 0.1 * jax.random.normal(keys[7], (C, C, 3, 3), dtype=jnp.float32)
    rconv2_b = 0.1 * jax.random.normal(keys[8], (C,), dtype=jnp.float32)
    rconv4_w = 0.1 * jax.random.normal(keys[9], (C, C, 3, 3), dtype=jnp.float32)
    rconv4_b = 0.1 * jax.random.normal(keys[10], (C,), dtype=jnp.float32)

    # Branch selection exactly as in forward():
    if module_dilation % 3 == 0:
        conv_w, conv_b, conv_dil = rconv1_w, rconv1_b, 1
    elif module_dilation % 3 == 1:
        conv_w, conv_b, conv_dil = rconv2_w, rconv2_b, 2
    else:
        conv_w, conv_b, conv_dil = rconv4_w, rconv4_b, 4

    out = dilated_residual_pallas(x, gamma, beta, conv_w, conv_b, conv_dil)
    out = jax.block_until_ready(out)

    ref = dilated_residual_reference(x, gamma, beta, conv_w, conv_b, conv_dil)
    ref = jax.block_until_ready(ref)

    assert out.shape == (N, C, H, W)
    assert jnp.allclose(out, ref, atol=1e-3, rtol=1e-3), (
        float(jnp.max(jnp.abs(out - ref))))

    print("KERNEL_OK")
</pallas_src>

<mosaic_0001>
module attributes {stable_mosaic.version = 11 : i64} {
  func.func @_dilated_residual_kernel(%arg0: i32, %arg1: memref<1x4x256xf32, #tpu.memory_space<vmem>>, %arg2: memref<4x1xf32, #tpu.memory_space<vmem>>, %arg3: memref<4x1xf32, #tpu.memory_space<vmem>>, %arg4: memref<9x4x4xf32, #tpu.memory_space<vmem>>, %arg5: memref<4x1xf32, #tpu.memory_space<vmem>>, %arg6: memref<9x1x256xf32, #tpu.memory_space<vmem>>, %arg7: memref<1x4x256xf32, #tpu.memory_space<vmem>>) attributes {dimension_semantics = [#tpu.dimension_semantics<parallel>], iteration_bounds = array<i64: 2>, scalar_prefetch = 0 : i64, scratch_operands = 0 : i64, tpu.core_type = #tpu.core_type<tc>, window_params = [{transform_indices = @transform_0, window_bounds = array<i64: 1, 4, 256>}, {pipeline_mode = #tpu.pipeline_mode<synchronous>, transform_indices = @transform_1, window_bounds = array<i64: 4, 1>}, {pipeline_mode = #tpu.pipeline_mode<synchronous>, transform_indices = @transform_2, window_bounds = array<i64: 4, 1>}, {pipeline_mode = #tpu.pipeline_mode<synchronous>, transform_indices = @transform_3, window_bounds = array<i64: 9, 4, 4>}, {pipeline_mode = #tpu.pipeline_mode<synchronous>, transform_indices = @transform_4, window_bounds = array<i64: 4, 1>}, {pipeline_mode = #tpu.pipeline_mode<synchronous>, transform_indices = @transform_5, window_bounds = array<i64: 9, 1, 256>}, {transform_indices = @transform_6, window_bounds = array<i64: 1, 4, 256>}]} {
    %c0 = arith.constant 0 : index
    %c0_0 = arith.constant 0 : index
    %c0_1 = arith.constant 0 : index
    %0 = vector.load %arg1[%c0, %c0_0, %c0_1] : memref<1x4x256xf32, #tpu.memory_space<vmem>>, vector<1x4x256xf32>
    %1 = vector.shape_cast %0 : vector<1x4x256xf32> to vector<4x256xf32>
    %c0_2 = arith.constant 0 : index
    %c0_3 = arith.constant 0 : index
    %2 = vector.load %arg2[%c0_2, %c0_3] : memref<4x1xf32, #tpu.memory_space<vmem>>, vector<4x1xf32>
    %3 = vector.broadcast %2 : vector<4x1xf32> to vector<4x256xf32>
    %4 = arith.mulf %1, %3 : vector<4x256xf32>
    %c0_4 = arith.constant 0 : index
    %c0_5 = arith.constant 0 : index
    %5 = vector.load %arg3[%c0_4, %c0_5] : memref<4x1xf32, #tpu.memory_space<vmem>>, vector<4x1xf32>
    %6 = vector.broadcast %5 : vector<4x1xf32> to vector<4x256xf32>
    %7 = arith.addf %4, %6 : vector<4x256xf32>
    %cst = arith.constant 0.000000e+00 : f32
    %8 = vector.broadcast %cst : f32 to vector<4x256xf32>
    %9 = arith.maximumf %7, %8 : vector<4x256xf32>
    %c0_6 = arith.constant 0 : index
    %c0_7 = arith.constant 0 : index
    %10 = vector.load %arg5[%c0_6, %c0_7] : memref<4x1xf32, #tpu.memory_space<vmem>>, vector<4x1xf32>
    %11 = vector.broadcast %10 : vector<4x1xf32> to vector<4x256xf32>
    %12 = arith.addf %1, %11 : vector<4x256xf32>
    %c34_i32 = arith.constant 34 : i32
    %13 = tpu.dynamic_rotate %9 by %c34_i32 dim 1 : vector<4x256xf32>, i32 -> vector<4x256xf32>
    %c0_8 = arith.constant 0 : index
    %c0_9 = arith.constant 0 : index
    %c0_10 = arith.constant 0 : index
    %14 = vector.load %arg6[%c0_8, %c0_9, %c0_10] : memref<9x1x256xf32, #tpu.memory_space<vmem>>, vector<1x1x256xf32>
    %15 = vector.shape_cast %14 : vector<1x1x256xf32> to vector<1x256xf32>
    %16 = vector.broadcast %15 : vector<1x256xf32> to vector<4x256xf32>
    %17 = arith.mulf %13, %16 : vector<4x256xf32>
    %c0_11 = arith.constant 0 : index
    %c0_12 = arith.constant 0 : index
    %c0_13 = arith.constant 0 : index
    %18 = vector.load %arg4[%c0_11, %c0_12, %c0_13] : memref<9x4x4xf32, #tpu.memory_space<vmem>>, vector<1x4x4xf32>
    %19 = vector.shape_cast %18 : vector<1x4x4xf32> to vector<4x4xf32>
    %cst_14 = arith.constant dense<0.000000e+00> : vector<4x256xf32>
    %20 = tpu.matmul %19, %17, %cst_14 {dimension_numbers = #tpu.dot_dimension_numbers<[1], [0], [0], [1], [0, 0, 1, 1], [], []>} : vector<4x4xf32>, vector<4x256xf32>, vector<4x256xf32> -> vector<4x256xf32>
    %21 = arith.addf %12, %20 : vector<4x256xf32>
    %c32_i32 = arith.constant 32 : i32
    %22 = tpu.dynamic_rotate %9 by %c32_i32 dim 1 : vector<4x256xf32>, i32 -> vector<4x256xf32>
    %c1 = arith.constant 1 : index
    %c0_15 = arith.constant 0 : index
    %c0_16 = arith.constant 0 : index
    %23 = vector.load %arg6[%c1, %c0_15, %c0_16] : memref<9x1x256xf32, #tpu.memory_space<vmem>>, vector<1x1x256xf32>
    %24 = vector.shape_cast %23 : vector<1x1x256xf32> to vector<1x256xf32>
    %25 = vector.broadcast %24 : vector<1x256xf32> to vector<4x256xf32>
    %26 = arith.mulf %22, %25 : vector<4x256xf32>
    %c1_17 = arith.constant 1 : index
    %c0_18 = arith.constant 0 : index
    %c0_19 = arith.constant 0 : index
    %27 = vector.load %arg4[%c1_17, %c0_18, %c0_19] : memref<9x4x4xf32, #tpu.memory_space<vmem>>, vector<1x4x4xf32>
    %28 = vector.shape_cast %27 : vector<1x4x4xf32> to vector<4x4xf32>
    %cst_20 = arith.constant dense<0.000000e+00> : vector<4x256xf32>
    %29 = tpu.matmul %28, %26, %cst_20 {dimension_numbers = #tpu.dot_dimension_numbers<[1], [0], [0], [1], [0, 0, 1, 1], [], []>} : vector<4x4xf32>, vector<4x256xf32>, vector<4x256xf32> -> vector<4x256xf32>
    %30 = arith.addf %21, %29 : vector<4x256xf32>
    %c30_i32 = arith.constant 30 : i32
    %31 = tpu.dynamic_rotate %9 by %c30_i32 dim 1 : vector<4x256xf32>, i32 -> vector<4x256xf32>
    %c2 = arith.constant 2 : index
    %c0_21 = arith.constant 0 : index
    %c0_22 = arith.constant 0 : index
    %32 = vector.load %arg6[%c2, %c0_21, %c0_22] : memref<9x1x256xf32, #tpu.memory_space<vmem>>, vector<1x1x256xf32>
    %33 = vector.shape_cast %32 : vector<1x1x256xf32> to vector<1x256xf32>
    %34 = vector.broadcast %33 : vector<1x256xf32> to vector<4x256xf32>
    %35 = arith.mulf %31, %34 : vector<4x256xf32>
    %c2_23 = arith.constant 2 : index
    %c0_24 = arith.constant 0 : index
    %c0_25 = arith.constant 0 : index
    %36 = vector.load %arg4[%c2_23, %c0_24, %c0_25] : memref<9x4x4xf32, #tpu.memory_space<vmem>>, vector<1x4x4xf32>
    %37 = vector.shape_cast %36 : vector<1x4x4xf32> to vector<4x4xf32>
    %cst_26 = arith.constant dense<0.000000e+00> : vector<4x256xf32>
    %38 = tpu.matmul %37, %35, %cst_26 {dimension_numbers = #tpu.dot_dimension_numbers<[1], [0], [0], [1], [0, 0, 1, 1], [], []>} : vector<4x4xf32>, vector<4x256xf32>, vector<4x256xf32> -> vector<4x256xf32>
    %39 = arith.addf %30, %38 : vector<4x256xf32>
    %c2_i32 = arith.constant 2 : i32
    %40 = tpu.dynamic_rotate %9 by %c2_i32 dim 1 : vector<4x256xf32>, i32 -> vector<4x256xf32>
    %c3 = arith.constant 3 : index
    %c0_27 = arith.constant 0 : index
    %c0_28 = arith.constant 0 : index
    %41 = vector.load %arg6[%c3, %c0_27, %c0_28] : memref<9x1x256xf32, #tpu.memory_space<vmem>>, vector<1x1x256xf32>
    %42 = vector.shape_cast %41 : vector<1x1x256xf32> to vector<1x256xf32>
    %43 = vector.broadcast %42 : vector<1x256xf32> to vector<4x256xf32>
    %44 = arith.mulf %40, %43 : vector<4x256xf32>
    %c3_29 = arith.constant 3 : index
    %c0_30 = arith.constant 0 : index
    %c0_31 = arith.constant 0 : index
    %45 = vector.load %arg4[%c3_29, %c0_30, %c0_31] : memref<9x4x4xf32, #tpu.memory_space<vmem>>, vector<1x4x4xf32>
    %46 = vector.shape_cast %45 : vector<1x4x4xf32> to vector<4x4xf32>
    %cst_32 = arith.constant dense<0.000000e+00> : vector<4x256xf32>
    %47 = tpu.matmul %46, %44, %cst_32 {dimension_numbers = #tpu.dot_dimension_numbers<[1], [0], [0], [1], [0, 0, 1, 1], [], []>} : vector<4x4xf32>, vector<4x256xf32>, vector<4x256xf32> -> vector<4x256xf32>
    %48 = arith.addf %39, %47 : vector<4x256xf32>
    %c4 = arith.constant 4 : index
    %c0_33 = arith.constant 0 : index
    %c0_34 = arith.constant 0 : index
    %49 = vector.load %arg4[%c4, %c0_33, %c0_34] : memref<9x4x4xf32, #tpu.memory_space<vmem>>, vector<1x4x4xf32>
    %50 = vector.shape_cast %49 : vector<1x4x4xf32> to vector<4x4xf32>
    %cst_35 = arith.constant dense<0.000000e+00> : vector<4x256xf32>
    %51 = tpu.matmul %50, %9, %cst_35 {dimension_numbers = #tpu.dot_dimension_numbers<[1], [0], [0], [1], [0, 0, 1, 1], [], []>} : vector<4x4xf32>, vector<4x256xf32>, vector<4x256xf32> -> vector<4x256xf32>
    %52 = arith.addf %48, %51 : vector<4x256xf32>
    %c254_i32 = arith.constant 254 : i32
    %53 = tpu.dynamic_rotate %9 by %c254_i32 dim 1 : vector<4x256xf32>, i32 -> vector<4x256xf32>
    %c5 = arith.constant 5 : index
    %c0_36 = arith.constant 0 : index
    %c0_37 = arith.constant 0 : index
    %54 = vector.load %arg6[%c5, %c0_36, %c0_37] : memref<9x1x256xf32, #tpu.memory_space<vmem>>, vector<1x1x256xf32>
    %55 = vector.shape_cast %54 : vector<1x1x256xf32> to vector<1x256xf32>
    %56 = vector.broadcast %55 : vector<1x256xf32> to vector<4x256xf32>
    %57 = arith.mulf %53, %56 : vector<4x256xf32>
    %c5_38 = arith.constant 5 : index
    %c0_39 = arith.constant 0 : index
    %c0_40 = arith.constant 0 : index
    %58 = vector.load %arg4[%c5_38, %c0_39, %c0_40] : memref<9x4x4xf32, #tpu.memory_space<vmem>>, vector<1x4x4xf32>
    %59 = vector.shape_cast %58 : vector<1x4x4xf32> to vector<4x4xf32>
    %cst_41 = arith.constant dense<0.000000e+00> : vector<4x256xf32>
    %60 = tpu.matmul %59, %57, %cst_41 {dimension_numbers = #tpu.dot_dimension_numbers<[1], [0], [0], [1], [0, 0, 1, 1], [], []>} : vector<4x4xf32>, vector<4x256xf32>, vector<4x256xf32> -> vector<4x256xf32>
    %61 = arith.addf %52, %60 : vector<4x256xf32>
    %c226_i32 = arith.constant 226 : i32
    %62 = tpu.dynamic_rotate %9 by %c226_i32 dim 1 : vector<4x256xf32>, i32 -> vector<4x256xf32>
    %c6 = arith.constant 6 : index
    %c0_42 = arith.constant 0 : index
    %c0_43 = arith.constant 0 : index
    %63 = vector.load %arg6[%c6, %c0_42, %c0_43] : memref<9x1x256xf32, #tpu.memory_space<vmem>>, vector<1x1x256xf32>
    %64 = vector.shape_cast %63 : vector<1x1x256xf32> to vector<1x256xf32>
    %65 = vector.broadcast %64 : vector<1x256xf32> to vector<4x256xf32>
    %66 = arith.mulf %62, %65 : vector<4x256xf32>
    %c6_44 = arith.constant 6 : index
    %c0_45 = arith.constant 0 : index
    %c0_46 = arith.constant 0 : index
    %67 = vector.load %arg4[%c6_44, %c0_45, %c0_46] : memref<9x4x4xf32, #tpu.memory_space<vmem>>, vector<1x4x4xf32>
    %68 = vector.shape_cast %67 : vector<1x4x4xf32> to vector<4x4xf32>
    %cst_47 = arith.constant dense<0.000000e+00> : vector<4x256xf32>
    %69 = tpu.matmul %68, %66, %cst_47 {dimension_numbers = #tpu.dot_dimension_numbers<[1], [0], [0], [1], [0, 0, 1, 1], [], []>} : vector<4x4xf32>, vector<4x256xf32>, vector<4x256xf32> -> vector<4x256xf32>
    %70 = arith.addf %61, %69 : vector<4x256xf32>
    %c224_i32 = arith.constant 224 : i32
    %71 = tpu.dynamic_rotate %9 by %c224_i32 dim 1 : vector<4x256xf32>, i32 -> vector<4x256xf32>
    %c7 = arith.constant 7 : index
    %c0_48 = arith.constant 0 : index
    %c0_49 = arith.constant 0 : index
    %72 = vector.load %arg6[%c7, %c0_48, %c0_49] : memref<9x1x256xf32, #tpu.memory_space<vmem>>, vector<1x1x256xf32>
    %73 = vector.shape_cast %72 : vector<1x1x256xf32> to vector<1x256xf32>
    %74 = vector.broadcast %73 : vector<1x256xf32> to vector<4x256xf32>
    %75 = arith.mulf %71, %74 : vector<4x256xf32>
    %c7_50 = arith.constant 7 : index
    %c0_51 = arith.constant 0 : index
    %c0_52 = arith.constant 0 : index
    %76 = vector.load %arg4[%c7_50, %c0_51, %c0_52] : memref<9x4x4xf32, #tpu.memory_space<vmem>>, vector<1x4x4xf32>
    %77 = vector.shape_cast %76 : vector<1x4x4xf32> to vector<4x4xf32>
    %cst_53 = arith.constant dense<0.000000e+00> : vector<4x256xf32>
    %78 = tpu.matmul %77, %75, %cst_53 {dimension_numbers = #tpu.dot_dimension_numbers<[1], [0], [0], [1], [0, 0, 1, 1], [], []>} : vector<4x4xf32>, vector<4x256xf32>, vector<4x256xf32> -> vector<4x256xf32>
    %79 = arith.addf %70, %78 : vector<4x256xf32>
    %c222_i32 = arith.constant 222 : i32
    %80 = tpu.dynamic_rotate %9 by %c222_i32 dim 1 : vector<4x256xf32>, i32 -> vector<4x256xf32>
    %c8 = arith.constant 8 : index
    %c0_54 = arith.constant 0 : index
    %c0_55 = arith.constant 0 : index
    %81 = vector.load %arg6[%c8, %c0_54, %c0_55] : memref<9x1x256xf32, #tpu.memory_space<vmem>>, vector<1x1x256xf32>
    %82 = vector.shape_cast %81 : vector<1x1x256xf32> to vector<1x256xf32>
    %83 = vector.broadcast %82 : vector<1x256xf32> to vector<4x256xf32>
    %84 = arith.mulf %80, %83 : vector<4x256xf32>
    %c8_56 = arith.constant 8 : index
    %c0_57 = arith.constant 0 : index
    %c0_58 = arith.constant 0 : index
    %85 = vector.load %arg4[%c8_56, %c0_57, %c0_58] : memref<9x4x4xf32, #tpu.memory_space<vmem>>, vector<1x4x4xf32>
    %86 = vector.shape_cast %85 : vector<1x4x4xf32> to vector<4x4xf32>
    %cst_59 = arith.constant dense<0.000000e+00> : vector<4x256xf32>
    %87 = tpu.matmul %86, %84, %cst_59 {dimension_numbers = #tpu.dot_dimension_numbers<[1], [0], [0], [1], [0, 0, 1, 1], [], []>} : vector<4x4xf32>, vector<4x256xf32>, vector<4x256xf32> -> vector<4x256xf32>
    %88 = arith.addf %79, %87 : vector<4x256xf32>
    %c0_60 = arith.constant 0 : index
    %c0_61 = arith.constant 0 : index
    %c0_62 = arith.constant 0 : index
    %89 = vector.load %arg7[%c0_60, %c0_61, %c0_62] : memref<1x4x256xf32, #tpu.memory_space<vmem>>, vector<1x4x256xf32>
    %90 = vector.shape_cast %89 : vector<1x4x256xf32> to vector<4x256xf32>
    %91 = vector.shape_cast %88 : vector<4x256xf32> to vector<1x4x256xf32>
    tpu.vector_store %arg7[%c0_60, %c0_61, %c0_62], %91 {strides = array<i32>} : memref<1x4x256xf32, #tpu.memory_space<vmem>>, vector<1x4x256xf32>,
    return
  }
  func.func @transform_0(%arg0: i32) -> (i32, i32, i32) {
    %c0_i32 = arith.constant 0 : i32
    %c0_i32_0 = arith.constant 0 : i32
    %c0_i32_1 = arith.constant 0 : i32
    return %arg0, %c0_i32, %c0_i32_0 : i32, i32, i32
  }
  func.func @transform_1(%arg0: i32) -> (i32, i32) {
    %c0_i32 = arith.constant 0 : i32
    %c0_i32_0 = arith.constant 0 : i32
    %c0_i32_1 = arith.constant 0 : i32
    return %c0_i32, %c0_i32_0 : i32, i32
  }
  func.func @transform_2(%arg0: i32) -> (i32, i32) {
    %c0_i32 = arith.constant 0 : i32
    %c0_i32_0 = arith.constant 0 : i32
    %c0_i32_1 = arith.constant 0 : i32
    return %c0_i32, %c0_i32_0 : i32, i32
  }
  func.func @transform_3(%arg0: i32) -> (i32, i32, i32) {
    %c0_i32 = arith.constant 0 : i32
    %c0_i32_0 = arith.constant 0 : i32
    %c0_i32_1 = arith.constant 0 : i32
    %c0_i32_2 = arith.constant 0 : i32
    return %c0_i32, %c0_i32_0, %c0_i32_1 : i32, i32, i32
  }
  func.func @transform_4(%arg0: i32) -> (i32, i32) {
    %c0_i32 = arith.constant 0 : i32
    %c0_i32_0 = arith.constant 0 : i32
    %c0_i32_1 = arith.constant 0 : i32
    return %c0_i32, %c0_i32_0 : i32, i32
  }
  func.func @transform_5(%arg0: i32) -> (i32, i32, i32) {
    %c0_i32 = arith.constant 0 : i32
    %c0_i32_0 = arith.constant 0 : i32
    %c0_i32_1 = arith.constant 0 : i32
    %c0_i32_2 = arith.constant 0 : i32
    return %c0_i32, %c0_i32_0, %c0_i32_1 : i32, i32, i32
  }
  func.func @transform_6(%arg0: i32) -> (i32, i32, i32) {
    %c0_i32 = arith.constant 0 : i32
    %c0_i32_0 = arith.constant 0 : i32
    %c0_i32_1 = arith.constant 0 : i32
    return %arg0, %c0_i32, %c0_i32_0 : i32, i32, i32
  }
}

</mosaic_0001>

<bundles_post_ra>
// kernel: tpu_custom_call.1
= control target key start
LH: loop header
LB: loop body
LE: loop exit
PB: predicated region body
PF: predicated region fallthrough
CT: control target
= control target key end

     0   :  { %11 = vsyncpa [#allocation3], 0  ;;  %s1808_s0 = inlined_call_operand.vmem [shape: f32[2,4,256], index: 0, kind: input, shape index: {}]   ;;  %s1809_s1 = inlined_call_operand.vmem [shape: f32[4,1], index: 1, kind: input, shape index: {}]   ;;  %s1810_s2 = inlined_call_operand.vmem [shape: f32[4,1], index: 2, kind: input, shape index: {}]   ;;  %s1811_s3 = inlined_call_operand.vmem [shape: f32[9,4,4], index: 3, kind: input, shape index: {}]   ;;  %s1812_s4 = inlined_call_operand.vmem [shape: f32[4,1], index: 4, kind: input, shape index: {}]   ;;  %s1813_s5 = inlined_call_operand.vmem [shape: f32[9,1,256], index: 5, kind: input, shape index: {}]   ;;  %s1814_s6 = inlined_call_operand.hbm [shape: f32[2,4,256], index: 6, kind: output, shape index: {}]  }
   0x1   :  { %13 = vsyncpa [#allocation3 + $0x1], 0  ;;  %s1549_s21 = smov 0   ;;  %s1551_s22 = smov 0  }
   0x2   :  { %s1553_s23 = smov 0   ;;  %s1555_s24 = smov 0  }
   0x3 LB: > { %s1570_s25 = sadd.s32 4294967295, %s1500_s24   ;;  %s1331_s26 = sadd.s32 4294967294, %s1500_s24   ;;  %s1500_s24 = sphi %s1555_s24, %s1820_s24   ;;  %s1496_s23 = sphi %s1553_s23, %s1819_s23   ;;  %s1492_s22 = sphi %s1551_s22, %s1818_s22   ;;  %s1488_s21 = sphi %s1549_s21, %s1817_s21  }
   0x4   : > { %s1574_s27 = sadd.s32 1, %s1500_s24   ;;  %s157_s28 = sadd.s32 1, %s1496_s23 }
   0x5   : > { %s154_s29 = ssub.s32 %s1500_s24, %s1574_s27  ;;  %p167_p0 = scmp.ne.s32.totalorder %s1496_s23, %s1492_s22 }
   0x6   : > { %p155_p1 = scmp.eq.s32.totalorder %s154_s29, 0  ;;  %p168_p2 = scmp.eq.s32.totalorder %s1570_s25, 1 }
   0x7   : > { %p173_p3 = scmp.ne.s32.totalorder %s1492_s22, %s1488_s21  ;;  %p174_p4 = scmp.eq.s32.totalorder %s1331_s26, 1 }
   0x8   : > { %s1585_s30 = scalar_select %p155_p1, %s1496_s23, %s157_s28  }
   0x9   : > { %p1587_p5 = por %p168_p2, %p167_p0  ;;  %p1591_p6 = por %p174_p4, %p173_p3 }
   0xa   : > { %p1334_p7 = scmp.ge.s32.totalorder %s1500_s24, 1  ;;  %p215_p8 = scmp.lt.s32.totalorder %s1500_s24, 3 }
   0xc   : > { %p216_p9 = pnand %p1334_p7, %p215_p8 }
   0xd   : > { %v251_v0 = vld [vmem:[%s1809_s1] sm:$0xf] (!%p216_p9)  ;;  %v1502_v1 = vmov (!%p216_p9), 0   ;;  %p245_p10 = scmp.lt.s32.totalorder (!%p216_p9), %s1570_s25, 1  ;;  %v1503_v3 = vmov (!%p216_p9), 839922192   ;;  %v259_v5 = vlaneseq (!%p216_p9) }
   0xe   : > { %219 = sbr.rel (%p216_p9) target bundleno = 536 (0x218), region = 44  ;;  %1437 = vset.pattern.permute.xlu0 (!%p216_p9), %v1502_v1  ;;  %v265_v2 = vld [vmem:[%s1810_s2] sm:$0xf] (!%p216_p9)  ;;  %v257_v4 = vunpack.c.l.s4 (!%p216_p9), %v1503_v3  ;;  %v1504_v15 = vmov (!%p216_p9), 0.0   ;;  %s1505_s18 = smov (!%p216_p9), 32   ;;  %vm325_vm1 = vcmask (!%p216_p9), 1043456  }
   0xf   : > { %254 = vperm.xlu0 (!%p216_p9), %1437, %v251_v0   ;;  %v260_v7 = vshrl.u32 (!%p216_p9), %v259_v5, 7  ;;  %396 = vmatprep.mubr.f32.mxu0 (!%p216_p9), %v1504_v15  ;;  %s1506_s19 = smov (!%p216_p9), 34   ;;  %s1507_s20 = smov (!%p216_p9), 30   ;;  %v280_v19 = vld [vmem:[%s1812_s4] sm:$0xf] (!%p216_p9)  ;;  %v1642_v20 = vand.u32 (!%p216_p9), 127, %v259_v5 }
  0x10   : > { %v258_v6 = vunpack.c.0.s8 (!%p216_p9), %v257_v4  ;;  %505 = vmatprep.mubr.f32.mxu1 (!%p216_p9), %v1504_v15  ;;  %s1508_s26 = smov (!%p216_p9), 2   ;;  %s1509_s28 = smov (!%p216_p9), 126   ;;  %v306_v23 = vld [vmem:[%s1813_s5] sm:$0x3] (!%p216_p9)  ;;  %v1341_v28 = vld [vmem:[%s1813_s5 + $0x2] sm:$0x3] (!%p216_p9) }
  0x11   : > { %s1510_s29 = smov (!%p216_p9), 98   ;;  %s1511_s9 = smov (!%p216_p9), 96   ;;  %v1644_v21 = vsub.s32 (!%p216_p9), 0, %v260_v7  ;;  %v1646_v22 = vsub.s32 (!%p216_p9), 1, %v260_v7  ;;  %vm303_vm0 = vcmp.lt.s32.totalorder (!%p216_p9), %v1642_v20, 34  ;;  %vm412_vm2 = vcmp.lt.s32.totalorder (!%p216_p9), %v1642_v20, 32 }
  0x12   : > { %v1605_v8 = vsub.s32 (!%p216_p9), %v258_v6, %v260_v7  ;;  %s1512_s10 = smov (!%p216_p9), 94   ;;  %v320_v37 = vld [vmem:[%s1811_s3] sm:$0xf] (!%p216_p9)  ;;  %vm321_vm3 = vcmask (!%p216_p9), 31744   ;;  %v1346_v38 = vld [vmem:[%s1813_s5 + $0x4] sm:$0x3] (!%p216_p9) }
  0x13   : > { %268 = vperm.xlu0 (!%p216_p9), %1437, %v265_v2   ;;  %v311_v26 = vrot.slane (!%p216_p9), %v306_v23, %v1644_v21  ;;  %v315_v27 = vrot.slane (!%p216_p9), %v306_v23, %v1646_v22  ;;  %v421_v35 = vrot.slane (!%p216_p9), %v1341_v28, %v1644_v21  ;;  %v425_v36 = vrot.slane (!%p216_p9), %v1341_v28, %v1646_v22  ;;  %v1342_v47 = vld [vmem:[%s1811_s3 + $0x4] sm:$0xf] (!%p216_p9)  ;;  %v1360_v57 = vld [vmem:[%s1813_s5 + $0xa] sm:$0x3] (!%p216_p9)  ;;  %v1365_v2 = vld [vmem:[%s1813_s5 + $0xc] sm:$0x3] (!%p216_p9) }
  0x14   : > { %vm521_vm4 = vcmp.lt.s32.totalorder (!%p216_p9), %v1642_v20, 30  ;;  %v530_v45 = vrot.slane (!%p216_p9), %v1346_v38, %v1644_v21  ;;  %v534_v46 = vrot.slane (!%p216_p9), %v1346_v38, %v1646_v22  ;;  %v1351_v48 = vld [vmem:[%s1813_s5 + $0x6] sm:$0x3] (!%p216_p9)  ;;  %vm630_vm5 = vcmp.lt.s32.totalorder (!%p216_p9), %v1642_v20, 2  ;;  %v1347_v58 = vld [vmem:[%s1811_s3 + $0x8] sm:$0xf] (!%p216_p9) }
  0x15   : > { %s246_s13 = scalar_select %p245_p10, %s1570_s25, 1  ;;  %v639_v55 = vrot.slane %v1351_v48, %v1644_v21  ;;  %v643_v56 = vrot.slane %v1351_v48, %v1646_v22  ;;  %v833_v62 = vrot.slane %v1360_v57, %v1644_v21  ;;  %vm824_vm6 = vcmp.lt.s32.totalorder %v1642_v20, 126  ;;  %v1352_v3 = vld [vmem:[%s1811_s3 + $0xc] sm:$0xf]  ;;  %v1356_v4 = vld [vmem:[%s1811_s3 + $0x10] sm:$0xf] }
  0x16   : > { %v837_v1 = vrot.slane %v1360_v57, %v1646_v22  ;;  %vm933_vm7 = vcmp.lt.s32.totalorder %v1642_v20, 98  ;;  %vm1042_vm8 = vcmp.lt.s32.totalorder %v1642_v20, 96  ;;  %vm1151_vm9 = vcmp.lt.s32.totalorder %v1642_v20, 94  ;;  %v1371_v38 = vld [vmem:[%s1811_s3 + $0x1c] sm:$0xf] }
  0x17   : > { %s1385_s14 = sshll.u32 %s246_s13, 3 }
  0x18   : > { %s249_s17 = scalar_lea.vmem %s1808_s0, %s1385_s14 }
  0x19   : > { %v1611_v11 = vld [vmem:[%s249_s17] sm:$0xff]  ;;  %s242_s17 = sand.u32 1, %s1492_s22  }
  0x8e   : > { %v255_v9 = vpop.permute.xlu0 %254 }
  0x8f   : > { %v262_v10 = vrot.slane %v255_v9, %v1605_v8 }
  0x91   : > { %v264_v13 = vmul.f32 %v262_v10, %v1611_v11  ;;  %v942_v10 = vrot.slane %v1365_v2, %v1644_v21 }
  0x92   : > { %v269_v12 = vpop.permute.xlu0 %268 }
  0x93   : > { %v276_v14 = vrot.slane %v269_v12, %v1605_v8 }
  0x95   : > { %v278_v16 = vadd.f32 %v276_v14, %v264_v13  ;;  %v946_v14 = vrot.slane %v1365_v2, %v1646_v22 }
  0x97   : > { %v1617_v17 = vmax.f32 %v278_v16, 0.0  ;;  %v1361_v16 = vld [vmem:[%s1811_s3 + $0x14] sm:$0xf] }
  0x99   : > { %408 = vrot.lane.b32.xlu0 %v1617_v17, %s1505_s18  ;;  %297 = vrot.lane.b32.xlu1 %v1617_v17, %s1506_s19  ;;  %v1623_v18 = vcombine.high %v1617_v17, %v1617_v17 }
  0x9d   : > { %517 = vrot.lane.b32.xlu0 %v1617_v17, %s1507_s20  ;;  %299 = vrot.lane.b32.xlu1 %v1623_v18, %s1506_s19  ;;  %s1386_s19 = sshll.u32 %s1570_s25, 7  ;;  %s1513_s25 = smov [#allocation2]  }
  0x9e   : > { %s1442_s12 = sshll.u32 %s1513_s25, 4  ;;  %s1443_s12 = int_to_ptr.vmem [resolvable:$false] %s1442_s12 }
  0x9f   : > { %s1444_s13 = scalar_lea.vmem %s1443_s12, 256 }
  0xa1   : > { %626 = vrot.lane.b32.xlu0 %v1617_v17, %s1508_s26  ;;  %410 = vrot.lane.b32.xlu1 %v1623_v18, %s1505_s18  ;;  %s1335_s18 = sshll.u32 %s242_s17, 3 }
  0xa5   : > { %820 = vrot.lane.b32.xlu0 %v1617_v17, %s1509_s28  ;;  %519 = vrot.lane.b32.xlu1 %v1623_v18, %s1507_s20  ;;  %s244_s20 = scalar_lea.vmem [#allocation2], %s1335_s18 }
  0xa9   : > { %929 = vrot.lane.b32.xlu0 %v1617_v17, %s1510_s29  ;;  %628 = vrot.lane.b32.xlu1 %v1623_v18, %s1508_s26  ;;  %s1272_s26 = sshll.u32 %s244_s20, 4  ;;  %s1768_s26 = int_to_ptr.vmem [resolvable:$true] %s1272_s26 }
  0xaa   : > { %s1438_s11 = scalar_lea.vmem %s1768_s26, 128  ;;  %p1445_p0 = scmp.lt.s32.totalorder %s1768_s26, %s1443_s12 }
  0xab   : > { %p1439_p11 = scmp.ne.s32.totalorder %s1768_s26, %s1438_s11  ;;  %p1446_p1 = scmp.lt.s32.totalorder %s1444_s13, %s1438_s11 }
  0xad   : > { %1038 = vrot.lane.b32.xlu0 %v1617_v17, %s1511_s9  ;;  %822 = vrot.lane.b32.xlu1 %v1623_v18, %s1509_s28  ;;  %p1440_p12 = pnand %p1439_p11, %p1587_p5  ;;  %p1447_p2 = por %p1446_p1, %p1445_p0 }
  0xaf   : > { %p1441_p13 = pneg %p1440_p12 }
  0xb1   : > { %1147 = vrot.lane.b32.xlu0 %v1617_v17, %s1512_s10  ;;  %931 = vrot.lane.b32.xlu1 %v1623_v18, %s1510_s29  ;;  %p1448_p3 = pnand %p1447_p2, %p1441_p13 }
  0xb5   : > { %283 = vperm.xlu0 %1437, %v280_v19   ;;  %1040 = vrot.lane.b32.xlu1 %v1623_v18, %s1511_s9  ;;  %s1766_s9 = scalar_lea.hbm %s1814_s6, %s1386_s19 }
  0xb9   : > { %1149 = vrot.lane.b32.xlu1 %v1623_v18, %s1512_s10  ;;  %s1258_s10 = scalar_lea.sflag [#allocation3], %s242_s17 }
 0x10b   : > { %v409_v24 = vpop.permute.xlu0 %408  ;;  %v298_v25 = vpop.permute.xlu1 %297 }
 0x10f   : > { %v518_v29 = vpop.permute.xlu0 %517  ;;  %v300_v30 = vpop.permute.xlu1 %299 }
 0x110   : > { %v304_v31 = vsel %vm303_vm0, %v298_v25, %v300_v30  ;;  %v305_v32 = vsel %vm303_vm0, %v300_v30, %v298_v25  ;;  %v1375_v30 = vld [vmem:[%s1813_s5 + $0x10] sm:$0x3] }
 0x111   : > { %v318_v33 = vmul.f32 %v311_v26, %v305_v32  ;;  %v319_v34 = vmul.f32 %v315_v27, %v304_v31 }
 0x113   : > { %v627_v39 = vpop.permute.xlu0 %626  ;;  %1338 = vmatprep.subr.msk.mxu0 %vm325_vm1, %v319_v34  ;;  %v411_v40 = vpop.permute.xlu1 %410 }
 0x114   : > { %v413_v41 = vsel %vm412_vm2, %v409_v24, %v411_v40  ;;  %v414_v42 = vsel %vm412_vm2, %v411_v40, %v409_v24  ;;  %1339 = vmatpush1.msk.msra.mxu0 %vm325_vm1, %v318_v33 }
 0x115   : > { %v428_v43 = vmul.f32 %v421_v35, %v414_v42  ;;  %1340 = vmatmul.mubr.msk.f32.vlgmr.msra.gmra.mrb[0].mxu0 %vm321_vm3, %v320_v37  ;;  %v429_v44 = vmul.f32 %v425_v36, %v413_v41  ;;  %v1160_v36 = vrot.slane %v1375_v30, %v1644_v21  ;;  %v1164_v37 = vrot.slane %v1375_v30, %v1646_v22 }
 0x116   : > { %614 = vmatprep.mubr.f32.mxu0 %v1504_v15 }
 0x117   : > { %1343 = vmatprep.subr.msk.mxu1 %vm325_vm1, %v429_v44  ;;  %v520_v49 = vpop.permute.xlu1 %519  ;;  %v821_v52 = vpop.permute.xlu0 %820 }
 0x118   : > { %v522_v50 = vsel %vm521_vm4, %v518_v29, %v520_v49  ;;  %v523_v51 = vsel %vm521_vm4, %v520_v49, %v518_v29  ;;  %1344 = vmatpush1.msk.msra.mxu1 %vm325_vm1, %v428_v43  ;;  %v1366_v29 = vld [vmem:[%s1811_s3 + $0x18] sm:$0xf] }
 0x119   : > { %v537_v53 = vmul.f32 %v530_v45, %v523_v51  ;;  %v538_v54 = vmul.f32 %v534_v46, %v522_v50  ;;  %1345 = vmatmul.mubr.msk.f32.vlgmr.msra.gmra.mrb[0].mxu1 %vm321_vm3, %v1342_v47 }
 0x11a   : > { %723 = vmatprep.mubr.f32.mxu1 %v1504_v15 }
 0x11b   : > { %1348 = vmatprep.subr.msk.mxu0 %vm325_vm1, %v538_v54  ;;  %v629_v59 = vpop.permute.xlu1 %628  ;;  %v930_v5 = vpop.permute.xlu0 %929 }
 0x11c   : > { %v631_v60 = vsel %vm630_vm5, %v627_v39, %v629_v59  ;;  %v632_v61 = vsel %vm630_vm5, %v629_v59, %v627_v39  ;;  %1349 = vmatpush1.msk.msra.mxu0 %vm325_vm1, %v537_v53 }
 0x11d   : > { %v646_v63 = vmul.f32 %v639_v55, %v632_v61  ;;  %v647_v0 = vmul.f32 %v643_v56, %v631_v60  ;;  %1350 = vmatmul.mubr.msk.f32.vlgmr.msra.gmra.mrb[2].mxu0 %vm321_vm3, %v1347_v58  ;;  %1357 = vmatprep.subr.msk.mxu0 %vm325_vm1, %v1623_v18 }
 0x11e   : > { %1358 = vmatpush1.msk.msra.mxu0 %vm325_vm1, %v1617_v17  ;;  %808 = vmatprep.mubr.f32.mxu0 %v1504_v15  ;;  %v1370_v17 = vld [vmem:[%s1813_s5 + $0xe] sm:$0x3] }
 0x11f   : > { %1353 = vmatprep.subr.msk.mxu1 %vm325_vm1, %v647_v0  ;;  %v823_v6 = vpop.permute.xlu1 %822  ;;  %v1039_v24 = vpop.permute.xlu0 %1038  ;;  %v1051_v27 = vrot.slane %v1370_v17, %v1644_v21  ;;  %v1055_v28 = vrot.slane %v1370_v17, %v1646_v22  ;;  %v1376_v21 = vld [vmem:[%s1811_s3 + $0x20] sm:$0xf] }
 0x120   : > { %v825_v7 = vsel %vm824_vm6, %v821_v52, %v823_v6  ;;  %v826_v9 = vsel %vm824_vm6, %v823_v6, %v821_v52  ;;  %1354 = vmatpush1.msk.msra.mxu1 %vm325_vm1, %v646_v63 }
 0x121   : > { %v840_v12 = vmul.f32 %v833_v62, %v825_v7  ;;  %v841_v13 = vmul.f32 %v837_v1, %v826_v9  ;;  %1355 = vmatmul.mubr.msk.f32.vlgmr.msra.gmra.mrb[2].mxu1 %vm321_vm3, %v1352_v3  ;;  %1359 = vmatmul.mubr.msk.f32.vlgmr.msra.gmra.mrb[4].mxu0 %vm321_vm3, %v1356_v4 }
 0x122   : > { %917 = vmatprep.mubr.f32.mxu1 %v1504_v15  ;;  %1026 = vmatprep.mubr.f32.mxu0 %v1504_v15 }
 0x123   : > { %1362 = vmatprep.subr.msk.mxu1 %vm325_vm1, %v841_v13  ;;  %v932_v18 = vpop.permute.xlu1 %931  ;;  %v1148_v39 = vpop.permute.xlu0 %1147 }
 0x124   : > { %v934_v19 = vsel %vm933_vm7, %v930_v5, %v932_v18  ;;  %v935_v23 = vsel %vm933_vm7, %v932_v18, %v930_v5  ;;  %1363 = vmatpush1.msk.msra.mxu1 %vm325_vm1, %v840_v12 }
 0x125   : > { %v949_v25 = vmul.f32 %v942_v10, %v934_v19  ;;  %v950_v26 = vmul.f32 %v946_v14, %v935_v23  ;;  %1364 = vmatmul.mubr.msk.f32.vlgmr.msra.gmra.mrb[4].mxu1 %vm321_vm3, %v1361_v16 }
 0x126   : > { %1135 = vmatprep.mubr.f32.mxu1 %v1504_v15 }
 0x127   : > { %1367 = vmatprep.subr.msk.mxu0 %vm325_vm1, %v950_v26  ;;  %v1041_v31 = vpop.permute.xlu1 %1040 }
 0x128   : > { %v1043_v32 = vsel %vm1042_vm8, %v1039_v24, %v1041_v31  ;;  %v1044_v33 = vsel %vm1042_vm8, %v1041_v31, %v1039_v24  ;;  %1368 = vmatpush1.msk.msra.mxu0 %vm325_vm1, %v949_v25 }
 0x129   : > { %v1058_v34 = vmul.f32 %v1051_v27, %v1043_v32  ;;  %v1059_v35 = vmul.f32 %v1055_v28, %v1044_v33  ;;  %1369 = vmatmul.mubr.msk.f32.vlgmr.msra.gmra.mrb[6].mxu0 %vm321_vm3, %v1366_v29 }
 0x12a   : > { %1244 = vmatprep.mubr.f32.mxu0 %v1504_v15 }
 0x12b   : > { %1372 = vmatprep.subr.msk.mxu1 %vm325_vm1, %v1059_v35  ;;  %v1150_v40 = vpop.permute.xlu1 %1149 }
 0x12c   : > { %v1152_v41 = vsel %vm1151_vm9, %v1148_v39, %v1150_v40  ;;  %v1153_v20 = vsel %vm1151_vm9, %v1150_v40, %v1148_v39  ;;  %1373 = vmatpush1.msk.msra.mxu1 %vm325_vm1, %v1058_v34 }
 0x12d   : > { %v1167_v42 = vmul.f32 %v1160_v36, %v1152_v41  ;;  %v1168_v43 = vmul.f32 %v1164_v37, %v1153_v20  ;;  %1374 = vmatmul.mubr.msk.f32.vlgmr.msra.gmra.mrb[6].mxu1 %vm321_vm3, %v1371_v38 }
 0x12f   : > { %1377 = vmatprep.subr.msk.mxu0 %vm325_vm1, %v1168_v43 }
 0x130   : > { %1378 = vmatpush1.msk.msra.mxu0 %vm325_vm1, %v1167_v42 }
 0x131   : > { %1379 = vmatmul.mubr.msk.f32.vlgmr.msra.gmra.mrb[8].mxu0 %vm321_vm3, %v1376_v21 }
 0x134   : > { %v284_v15 = vpop.permute.xlu0 %283 }
 0x135   : > { %v291_v22 = vrot.slane %v284_v15, %v1605_v8 }
 0x137   : > { %v293_v47 = vadd.f32 %v291_v22, %v1611_v11 }
 0x1e8   : > { %v398_v44 = vpop.f32.mrb[0].mxu0 }
 0x1e9   : > { %v400_v45 = vpop.f32.mrb[1].mxu0 }
 0x1ea   : > { %v405_v46 = vcombine.low %v398_v44, %v400_v45 }
 0x1ec   : > { %v507_v48 = vpop.f32.mrb[0].mxu1  ;;  %v407_v50 = vadd.f32 %v405_v46, %v293_v47 }
 0x1ed   : > { %v509_v49 = vpop.f32.mrb[1].mxu1 }
 0x1ee   : > { %v514_v51 = vcombine.low %v507_v48, %v509_v49 }
 0x1f0   : > { %v516_v52 = vadd.f32 %v514_v51, %v407_v50  ;;  %v616_v53 = vpop.f32.mrb[2].mxu0 }
 0x1f1   : > { %v618_v54 = vpop.f32.mrb[3].mxu0 }
 0x1f2   : > { %v623_v55 = vcombine.low %v616_v53, %v618_v54 }
 0x1f4   : > { %v625_v56 = vadd.f32 %v623_v55, %v516_v52  ;;  %v725_v57 = vpop.f32.mrb[2].mxu1  ;;  %v810_v58 = vpop.f32.mrb[4].mxu0 }
 0x1f5   : > { %v727_v59 = vpop.f32.mrb[3].mxu1  ;;  %v812_v60 = vpop.f32.mrb[5].mxu0 }
 0x1f6   : > { %v732_v8 = vcombine.low %v725_v57, %v727_v59  ;;  %v817_v61 = vcombine.low %v810_v58, %v812_v60 }
 0x1f8   : > { %v734_v62 = vadd.f32 %v732_v8, %v625_v56  ;;  %v919_v63 = vpop.f32.mrb[4].mxu1 }
 0x1f9   : > { %v921_v0 = vpop.f32.mrb[5].mxu1 }
 0x1fa   : > { %v819_v11 = vadd.f32 %v817_v61, %v734_v62  ;;  %v926_v1 = vcombine.low %v919_v63, %v921_v0 }
 0x1fc   : > { %v928_v2 = vadd.f32 %v926_v1, %v819_v11  ;;  %v1028_v3 = vpop.f32.mrb[6].mxu0 }
 0x1fd   : > { %v1030_v4 = vpop.f32.mrb[7].mxu0 }
 0x1fe   : > { %v1035_v5 = vcombine.low %v1028_v3, %v1030_v4 }
 0x200   : > { %v1037_v6 = vadd.f32 %v1035_v5, %v928_v2  ;;  %v1137_v7 = vpop.f32.mrb[6].mxu1 }
 0x201   : > { %v1139_v9 = vpop.f32.mrb[7].mxu1 }
 0x202   : > { %v1144_v10 = vcombine.low %v1137_v7, %v1139_v9 }
 0x204   : > { %v1146_v12 = vadd.f32 %v1144_v10, %v1037_v6  ;;  %v1246_v13 = vpop.f32.mrb[8].mxu0 }
 0x205   : > { %v1248_v14 = vpop.f32.mrb[9].mxu0 }
 0x206   : > { %v1253_v16 = vcombine.low %v1246_v13, %v1248_v14 }
 0x208   : > { %v1255_v17 = vadd.f32 %v1253_v16, %v1146_v12 }
 0x20a   : > { %1256 = vst [vmem:[%s244_s20] sm:$0xff] %v1255_v17 }
 0x20b   : > { %1451 = shalt.err (!%p1448_p3)
}
 0x20c   : > { %s1452_s14 = scalar_lea.hbm %s1766_s9, 128  ;;  %s1456_s17 = scalar_lea.hbm %s1814_s6, 256 }
 0x20d   : > { %p1453_p4 = scmp.ne.s32.totalorder %s1766_s9, %s1452_s14  ;;  %p1457_p9 = scmp.lt.u32.totalorder %s1766_s9, %s1814_s6 }
 0x20e   : > { %p1458_p10 = scmp.lt.u32.totalorder %s1456_s17, %s1452_s14  ;;  %p1460_p12 = scmp.lt.u32.totalorder %s1452_s14, %s1766_s9 }
 0x20f   : > { %p1454_p7 = pnand %p1453_p4, %p1587_p5 }
 0x210   : > { %p1459_p11 = por %p1458_p10, %p1457_p9 }
 0x211   : > { %p1455_p8 = pneg %p1454_p7 }
 0x212   : > { %p1461_p13 = por %p1460_p12, %p1459_p11 }
 0x214   : > { %p1462_p0 = pnand %p1461_p13, %p1455_p8 }
 0x216   : > { %1465 = shalt.err (!%p1462_p0)
}
 0x217   : > { %1387 = dma.vmem_to_hbm [thread:$0]  (%p1587_p5), %s1768_s26, 128, %s1766_s9, %s1258_s10  }
 0x218 PF: > { %p1393_p1 = scmp.ge.s32.totalorder %s1500_s24, 2  ;;  %s1284_s20 = sand.u32 1, %s1488_s21  }
 0x219   : > { %s1285_s28 = scalar_lea.sflag [#allocation3], %s1284_s20 }
 0x21a   : > { %p1390_p2 = pnand %p1393_p1, %p1591_p6 }
 0x21c   : > { %1483 = dma.done.wait (!%p1390_p2), %s1285_s28, 128  }
 0x21d   : > { %1485 = vsyncadd (!%p1390_p2), %s1285_s28, 4294967168  ;;  %p16_p3 = scmp.ge.s32.totalorder %s1574_s27, 4   ;;  %s1817_s21 = smov %s1492_s22 }
 0x21e   : > { %s1818_s22 = smov %s1496_s23  ;;  %s1819_s23 = smov %s1585_s30 }
 0x21f   : > { %s1820_s24 = smov %s1574_s27  ;;  %18 = sbr.rel (!%p16_p3) target bundleno = 3 (0x3), region = 94 }
 0x226   :  { %1290 = vsyncpa [#allocation3], 1 }
 0x227   :  { %1292 = vsyncpa [#allocation3 + $0x1], 1 }

</bundles_post_ra>
